<compile_context>
chip_gen: v7x
topology: tpu7x:2x2x1
jax: 0.10.0
libtpu: 0.0.40
codegen_flags: <defaults>
</compile_context>

<pallas_src>
import functools

import jax
import jax.numpy as jnp
from jax.experimental import pallas as pl
from jax.experimental.pallas import tpu as pltpu


def _round_up(x, m):
    return ((x + m - 1) // m) * m


def _cdiv(a, b):
    return -(-a // b)


def _choose_tile_m(M, A, K, tile_m_req):
    """Row-tile size with *real* VMEM accounting.

    Per pipelined block, VMEM tiling pads lanes to 128 and sublanes to 8, and
    each block is double-buffered:
      x        (tile_m, A)    -> tile_m * round_up(A,128)   * 4 B  (x2)
      logits^T (K+1, tile_m)  -> round_up(K+1,8) * tile_m   * 4 B  (x2)
      obj      (1, tile_m)    -> 8 * tile_m                 * 4 B  (x2)
    (the resident W^T block is a few tens of KiB and ignored here).
    """
    if M <= 128:
        return M  # single block; every block dim equals the full array dim

    per_row_bytes = 2 * 4 * (_round_up(A, 128) + _round_up(K + 1, 8) + 8)
    vmem_budget = 12 * 1024 * 1024          # headroom under v5e's 16 MiB default
    cap_vmem = max(128, (vmem_budget // per_row_bytes) // 128 * 128)

    # Keep >= 2 (ideally ~4) grid steps for megacore sharding on v7x, but do
    # not shrink tiles below 1024 rows (per-step overhead would dominate).
    cap_cores = max(1024, _round_up(_cdiv(M, 4), 128))

    tm = min(tile_m_req, cap_vmem, cap_cores, _round_up(M, 128))
    return max(128, (tm // 128) * 128)


def _unk_det_kernel(x_ref, wt_ref, logits_t_ref, obj_ref, *, known_dims):
    """Per-row-tile hot path: matmul + unknown-max + sigmoid-max + mcm.

    All outputs are produced lane-dense (rows of the original problem live on
    the 128-lane axis), so the writeback uses full-width stores.
    """
    x = x_ref[...]                                   # (TM, A)  f32
    w_t = wt_ref[...]                                # (D, A)   f32

    # (D, TM) = W^T @ x^T, expressed as a rhs-transposed contraction over A
    # (the same pattern as Q.K^T) so no large operand transpose is needed and
    # the class axis lands on sublanes / rows on lanes.
    full_t = jax.lax.dot_general(
        w_t, x,
        dimension_numbers=(((1,), (1,)), ((), ())),
        preferred_element_type=jnp.float32)          # (D, TM)

    k_t = full_t[:known_dims, :]                     # (K, TM)

    # Two direct slice stores (no in-kernel concatenate, no masked lane stores).
    logits_t_ref[:known_dims, :] = k_t
    logits_t_ref[known_dims:, :] = jnp.max(
        full_t[known_dims:, :], axis=0, keepdims=True)   # (1, TM)

    # 'sigmoid' + 'max': max(sigmoid(x)) == sigmoid(max(x)) (monotonic) ->
    # one transcendental per row instead of per element.
    obj = jax.nn.sigmoid(jnp.max(x, axis=-1))        # (TM,)
    obj = obj.reshape(1, x.shape[0])                 # (1, TM) lane-dense

    # 'mcm': max(softmax(k)) == 1 / sum(exp(k - max(k))).  With the transposed
    # layout these are cheap sublane reductions straight into (1, TM).
    m = jnp.max(k_t, axis=0, keepdims=True)                      # (1, TM)
    sum_e = jnp.sum(jnp.exp(k_t - m), axis=0, keepdims=True)     # (1, TM)
    # exact reciprocal to stay bit-close to the reference (approx=True would
    # likely break the 1e-5 allclose and VALU is not the binding slot anyway).
    obj_ref[...] = obj * (1.0 - pl.reciprocal(sum_e))


def _normalize_kernel(obj_ref, out_ref):
    """proc_obj: sigmoid((obj - mean) / std) with unbiased std over all rows."""
    v = obj_ref[...]                                 # (1, M) f32, exact M (no pad)
    n = v.shape[1]
    mean = jnp.sum(v) / n
    centered = v - mean
    var = jnp.sum(centered * centered) / (n - 1)     # torch .std(): unbiased
    out_ref[...] = jax.nn.sigmoid(centered * jax.lax.rsqrt(var))


def unk_det_head(att_logits, att_W, known_dims, *, tile_m=8192):
    """att_logits: (B, Q, A) f32; att_W: (A, D) f32 -> ((B, Q, K+1), (B, Q))."""
    B, Q, A = att_logits.shape
    A2, D = att_W.shape
    assert A == A2
    assert 0 < known_dims < D, "need at least one unknown column"
    K = known_dims
    M = B * Q

    x = att_logits.reshape(M, A)     # metadata-only reshape (no copy, no pad)
    w_t = att_W.T                    # (D, A) — tiny one-off transpose, resident in VMEM

    tm = _choose_tile_m(M, A, K, tile_m)
    grid_m = _cdiv(M, tm)            # partial last block handled by Pallas

    kernel = functools.partial(_unk_det_kernel, known_dims=K)
    logits_t, obj_row = pl.pallas_call(
        kernel,
        out_shape=(
            jax.ShapeDtypeStruct((K + 1, M), jnp.float32),   # lane-dense logits^T
            jax.ShapeDtypeStruct((1, M), jnp.float32),       # lane-dense objectness
        ),
        grid_spec=pltpu.PrefetchScalarGridSpec(
            num_scalar_prefetch=0,
            grid=(grid_m,),
            in_specs=[
                pl.BlockSpec((tm, A), lambda i: (i, 0)),
                pl.BlockSpec((D, A), lambda i: (0, 0)),      # W^T stays resident
            ],
            out_specs=[
                pl.BlockSpec((K + 1, tm), lambda i: (0, i)),
                pl.BlockSpec((1, tm), lambda i: (0, i)),
            ],
        ),
        compiler_params=pltpu.CompilerParams(
            dimension_semantics=("parallel",),
            vmem_limit_bytes=32 * 1024 * 1024,   # <= v7x 64 MiB physical; >> our ~10 MiB use
        ),
    )(x, w_t)

    # Global mean / unbiased-std / sigmoid over all M rows.  Single (1, M)
    # block (~8*M bytes of VMEM incl. padding/double-buffering) — fine for
    # detection-scale M (up to ~1e6 queries); tile it only if M grows beyond that.
    obj_norm = pl.pallas_call(
        _normalize_kernel,
        out_shape=jax.ShapeDtypeStruct((1, M), jnp.float32),
        in_specs=[pl.BlockSpec((1, M), lambda: (0, 0))],
        out_specs=pl.BlockSpec((1, M), lambda: (0, 0)),
    )(obj_row)

    # One small transposing copy of (K+1, M) -> (B, Q, K+1); the obj reshape is free.
    logits = logits_t.T.reshape(B, Q, K + 1)
    objectness = obj_norm.reshape(B, Q)
    return logits, objectness


def _reference(att_logits, att_W, known_dims):
    """Pure-JAX reference mirroring the PyTorch forward (sigmoid-max-mcm)."""
    full = att_logits @ att_W
    k = full[..., :known_dims]
    unk = jnp.max(full[..., known_dims:], axis=-1, keepdims=True)
    logits = jnp.concatenate([k, unk], axis=-1)
    obj = jnp.max(jax.nn.sigmoid(att_logits), axis=-1, keepdims=True)
    mcm = jnp.max(jax.nn.softmax(k, axis=-1), axis=-1, keepdims=True)
    obj = obj * (1.0 - mcm)
    obj = obj - jnp.mean(obj)
    obj = obj / jnp.std(obj, ddof=1)
    obj = jax.nn.sigmoid(obj)
    return logits, jnp.squeeze(obj, -1)


def _check(B, Q, A, D, K, key):
    k1, k2 = jax.random.split(key)
    att_logits = jax.random.normal(k1, (B, Q, A), dtype=jnp.float32)
    att_W = jax.random.normal(k2, (A, D), dtype=jnp.float32) * 0.1

    logits, objectness = unk_det_head(att_logits, att_W, K)
    jax.block_until_ready((logits, objectness))

    ref_logits, ref_obj = _reference(att_logits, att_W, K)
    assert logits.shape == (B, Q, K + 1)
    assert objectness.shape == (B, Q)
    assert jnp.allclose(logits, ref_logits, atol=1e-5, rtol=1e-5)
    assert jnp.allclose(objectness, ref_obj, atol=1e-5, rtol=1e-5)


if __name__ == "__main__":
    key = jax.random.PRNGKey(0)
    k1, k2 = jax.random.split(key)

    # Small shapes: batch=2, queries=8, attribute dim A=32, total classes D=16,
    # known classes K=8 (single full block path).
    _check(B=2, Q=8, A=32, D=16, K=8, key=k1)

    # Slightly larger ragged case: exercises the multi-step grid, the resident
    # W^T block and the partial last block (M = 2331 not a multiple of 1024).
    _check(B=3, Q=777, A=32, D=16, K=8, key=k2)

    print("KERNEL_OK")
</pallas_src>

<mosaic_0001>
module attributes {stable_mosaic.version = 11 : i64} {
  func.func @_unk_det_kernel(%arg0: i32, %arg1: memref<16x32xf32, #tpu.memory_space<vmem>>, %arg2: memref<16x32xf32, #tpu.memory_space<vmem>>, %arg3: memref<9x16xf32, #tpu.memory_space<vmem>>, %arg4: memref<1x16xf32, #tpu.memory_space<vmem>>) attributes {dimension_semantics = [#tpu.dimension_semantics<parallel>], iteration_bounds = array<i64: 1>, scalar_prefetch = 0 : i64, scratch_operands = 0 : i64, tpu.core_type = #tpu.core_type<tc>, window_params = [{transform_indices = @transform_0, window_bounds = array<i64: 16, 32>}, {pipeline_mode = #tpu.pipeline_mode<synchronous>, transform_indices = @transform_1, window_bounds = array<i64: 16, 32>}, {transform_indices = @transform_2, window_bounds = array<i64: 9, 16>}, {transform_indices = @transform_3, window_bounds = array<i64: 1, 16>}]} {
    %c0 = arith.constant 0 : index
    %c0_0 = arith.constant 0 : index
    %0 = vector.load %arg1[%c0, %c0_0] : memref<16x32xf32, #tpu.memory_space<vmem>>, vector<16x32xf32>
    %c0_1 = arith.constant 0 : index
    %c0_2 = arith.constant 0 : index
    %1 = vector.load %arg2[%c0_1, %c0_2] : memref<16x32xf32, #tpu.memory_space<vmem>>, vector<16x32xf32>
    %cst = arith.constant dense<0.000000e+00> : vector<16x16xf32>
    %2 = tpu.matmul %1, %0, %cst {dimension_numbers = #tpu.dot_dimension_numbers<[1], [1], [0], [0], [0, 0, 1, 0], [], []>} : vector<16x32xf32>, vector<16x32xf32>, vector<16x16xf32> -> vector<16x16xf32>
    %3 = vector.extract_strided_slice %2 {offsets = [0, 0], sizes = [8, 16], strides = [1, 1]} : vector<16x16xf32> to vector<8x16xf32>
    %c0_3 = arith.constant 0 : index
    %c0_4 = arith.constant 0 : index
    %4 = vector.load %arg3[%c0_3, %c0_4] : memref<9x16xf32, #tpu.memory_space<vmem>>, vector<8x16xf32>
    tpu.vector_store %arg3[%c0_3, %c0_4], %3 {strides = array<i32>} : memref<9x16xf32, #tpu.memory_space<vmem>>, vector<8x16xf32>,
    %5 = vector.extract_strided_slice %2 {offsets = [8, 0], sizes = [8, 16], strides = [1, 1]} : vector<16x16xf32> to vector<8x16xf32>
    %cst_5 = arith.constant dense<0xFF800000> : vector<16xf32>
    %6 = vector.multi_reduction <maximumf>, %5, %cst_5 [0] : vector<8x16xf32> to vector<16xf32>
    %7 = vector.shape_cast %6 : vector<16xf32> to vector<1x16xf32>
    %c8 = arith.constant 8 : index
    %c0_6 = arith.constant 0 : index
    %8 = vector.load %arg3[%c8, %c0_6] : memref<9x16xf32, #tpu.memory_space<vmem>>, vector<1x16xf32>
    tpu.vector_store %arg3[%c8, %c0_6], %7 {strides = array<i32>} : memref<9x16xf32, #tpu.memory_space<vmem>>, vector<1x16xf32>,
    %cst_7 = arith.constant dense<0xFF800000> : vector<16xf32>
    %9 = vector.multi_reduction <maximumf>, %0, %cst_7 [1] : vector<16x32xf32> to vector<16xf32>
    %10 = arith.negf %9 : vector<16xf32>
    %11 = math.exp %10 : vector<16xf32>
    %cst_8 = arith.constant 1.000000e+00 : f32
    %12 = vector.broadcast %cst_8 : f32 to vector<16xf32>
    %13 = arith.addf %12, %11 : vector<16xf32>
    %14 = arith.divf %12, %13 : vector<16xf32>
    %15 = vector.shape_cast %14 : vector<16xf32> to vector<1x16xf32>
    %cst_9 = arith.constant dense<0xFF800000> : vector<16xf32>
    %16 = vector.multi_reduction <maximumf>, %3, %cst_9 [0] : vector<8x16xf32> to vector<16xf32>
    %17 = vector.shape_cast %16 : vector<16xf32> to vector<1x16xf32>
    %18 = vector.broadcast %17 : vector<1x16xf32> to vector<8x16xf32>
    %19 = arith.subf %3, %18 : vector<8x16xf32>
    %20 = math.exp %19 : vector<8x16xf32>
    %cst_10 = arith.constant dense<0.000000e+00> : vector<16xf32>
    %21 = vector.multi_reduction <add>, %20, %cst_10 [0] : vector<8x16xf32> to vector<16xf32>
    %22 = vector.shape_cast %21 : vector<16xf32> to vector<1x16xf32>
    %23 = tpu.reciprocal %22 : vector<1x16xf32> -> vector<1x16xf32>
    %cst_11 = arith.constant 1.000000e+00 : f32
    %24 = vector.broadcast %cst_11 : f32 to vector<1x16xf32>
    %25 = arith.subf %24, %23 : vector<1x16xf32>
    %26 = arith.mulf %15, %25 : vector<1x16xf32>
    %c0_12 = arith.constant 0 : index
    %c0_13 = arith.constant 0 : index
    %27 = vector.load %arg4[%c0_12, %c0_13] : memref<1x16xf32, #tpu.memory_space<vmem>>, vector<1x16xf32>
    tpu.vector_store %arg4[%c0_12, %c0_13], %26 {strides = array<i32>} : memref<1x16xf32, #tpu.memory_space<vmem>>, vector<1x16xf32>,
    return
  }
  func.func @transform_0(%arg0: i32) -> (i32, i32) {
    %c0_i32 = arith.constant 0 : i32
    %c0_i32_0 = arith.constant 0 : i32
    return %arg0, %c0_i32 : i32, i32
  }
  func.func @transform_1(%arg0: i32) -> (i32, i32) {
    %c0_i32 = arith.constant 0 : i32
    %c0_i32_0 = arith.constant 0 : i32
    %c0_i32_1 = arith.constant 0 : i32
    return %c0_i32, %c0_i32_0 : i32, i32
  }
  func.func @transform_2(%arg0: i32) -> (i32, i32) {
    %c0_i32 = arith.constant 0 : i32
    %c0_i32_0 = arith.constant 0 : i32
    return %c0_i32, %arg0 : i32, i32
  }
  func.func @transform_3(%arg0: i32) -> (i32, i32) {
    %c0_i32 = arith.constant 0 : i32
    %c0_i32_0 = arith.constant 0 : i32
    return %c0_i32, %arg0 : i32, i32
  }
}

</mosaic_0001>

<bundles_post_ra>
// kernel: tpu_custom_call.1
= control target key start
LH: loop header
LB: loop body
LE: loop exit
PB: predicated region body
PF: predicated region fallthrough
CT: control target
= control target key end

     0   :  { %9 = vsyncpa [#allocation3], 0  ;;  %s480_s0 = inlined_call_operand.hbm [shape: f32[16,32], index: 0, kind: input, shape index: {}]   ;;  %s481_s1 = inlined_call_operand.hbm [shape: f32[16,32], index: 1, kind: input, shape index: {}]   ;;  %s482_s2 = inlined_call_operand.hbm [shape: f32[9,16], index: 2, kind: output, shape index: {0}]   ;;  %s483_s3 = inlined_call_operand.hbm [shape: f32[1,16], index: 3, kind: output, shape index: {1}]  }
   0x1   :  { %10 = vsyncpa [#allocation6], 0 }
   0x2   :  { %11 = vsyncpa [#allocation4], 0 }
   0x3   :  { %12 = vsyncpa [#allocation9], 0  ;;  %s390_s12 = smov [#allocation2]   ;;  %s294_s16 = scalar_lea.hbm %s480_s0, 256 }
   0x4   :  { %s18_s13 = sshll.u32 %s390_s12, 4  ;;  %p295_p0 = scmp.ne.s32.totalorder %s480_s0, %s294_s16  ;;  %s19_s13 = int_to_ptr.vmem [resolvable:$true] %s18_s13 }
   0x5   :  { %p298_p1 = scmp.lt.u32.totalorder %s294_s16, %s480_s0 }
   0x7   :  { %p300_p2 = pnand %p298_p1, %p295_p0 }
   0x9   :  { %303 = shalt.err (!%p300_p2)
}
   0xa   :  { %s304_s21 = scalar_lea.vmem %s19_s13, 256  ;;  %p309_p4 = scmp.lt.s32.totalorder %s19_s13, %s19_s13 }
   0xb   :  { %p305_p3 = scmp.ne.s32.totalorder %s19_s13, %s304_s21  ;;  %p310_p5 = scmp.lt.s32.totalorder %s304_s21, %s304_s21 }
   0xd   :  { %p311_p6 = por %p310_p5, %p309_p4 }
   0xf   :  { %p312_p7 = pnand %p311_p6, %p305_p3 }
  0x11   :  { %315 = shalt.err (!%p312_p7)
}
  0x12   :  { %s391_s22 = smov 128   ;;  %s392_s23 = smov 8  }
  0x13   :  { %24 = dma.hbm_to_vmem [thread:$0]  %s480_s0, 256, %s19_s13, [#allocation3], %s391_s22, %s391_s22, %s392_s23  }
  0x14   :  { %s393_s26 = smov [#allocation5]   ;;  %s316_s30 = scalar_lea.hbm %s481_s1, 256 }
  0x15   :  { %s30_s27 = sshll.u32 %s393_s26, 4  ;;  %p317_p8 = scmp.ne.s32.totalorder %s481_s1, %s316_s30  ;;  %s31_s27 = int_to_ptr.vmem [resolvable:$true] %s30_s27 }
  0x16   :  { %p320_p9 = scmp.lt.u32.totalorder %s316_s30, %s481_s1 }
  0x18   :  { %p322_p10 = pnand %p320_p9, %p317_p8 }
  0x1a   :  { %325 = shalt.err (!%p322_p10)
}
  0x1b   :  { %s326_s8 = scalar_lea.vmem %s31_s27, 256  ;;  %p331_p12 = scmp.lt.s32.totalorder %s31_s27, %s31_s27 }
  0x1c   :  { %p327_p11 = scmp.ne.s32.totalorder %s31_s27, %s326_s8  ;;  %p332_p13 = scmp.lt.s32.totalorder %s326_s8, %s326_s8 }
  0x1e   :  { %p333_p0 = por %p332_p13, %p331_p12 }
  0x20   :  { %p334_p1 = pnand %p333_p0, %p327_p11 }
  0x22   :  { %337 = shalt.err (!%p334_p1)
}
  0x23   :  { %36 = dma.hbm_to_vmem [thread:$0]  %s481_s1, 256, %s31_s27, [#allocation6], %s391_s22, %s391_s22, %s392_s23  }
  0x24   :  { %382 = dma.done.wait [#allocation3], 256  }
  0x25   :  { %383 = vsyncadd [#allocation3], 4294967040 }
  0x26   :  { %384 = dma.done.wait [#allocation6], 256  }
  0x27   :  { %385 = vsyncadd [#allocation6], 4294967040  ;;  %vm47_vm0 = vcmask 261120   ;;  %v43_v0 = vld [vmem:[#allocation2] sm:$0xff]  ;;  %v44_v1 = vld [vmem:[#allocation2 + $0x8] sm:$0xff]  ;;  %vm135_vm2 = vcmask 130048  }
  0x28   :  { %vm268_vm1 = vmpackc.low %vm47_vm0, %vm47_vm0  ;;  %v45_v2 = vld [vmem:[#allocation5] sm:$0xff]  ;;  %v267_v3 = vpack.c.bf16 %v44_v1, %v43_v0  ;;  %v46_v4 = vld [vmem:[#allocation5 + $0x8] sm:$0xff]  ;;  %v146_v5 = vsel %vm47_vm0, %v43_v0, -inf  ;;  %v149_v6 = vsel %vm47_vm0, %v44_v1, -inf  ;;  %vm144_vm3 = vcmask 122880   ;;  %s395_s1 = smov [#allocation7]  }
  0x29   :  { %264 = vmatprep.mubr.msk.f32.mxu0 %vm47_vm0, %v45_v2  ;;  %147 = vmax.xlane.f32.xlu0 %v146_v5  ;;  %v394_v33 = vmov 0   ;;  %s223_s10 = sshll.u32 %s395_s1, 4  ;;  %s224_s10 = int_to_ptr.vmem [resolvable:$true] %s223_s10 }
  0x2a   :  { %269 = vmatprep.subr.msk.bf16.mxu0 %vm268_vm1, %v267_v3  ;;  %280 = vset.pattern.permute.xlu0 %v394_v33  ;;  %s338_s11 = scalar_lea.vmem %s224_s10, 256  ;;  %p343_p3 = scmp.lt.s32.totalorder %s224_s10, %s224_s10 }
  0x2b   :  { %272 = vmatpush3.bf16.xpose.msk.msra.mxu0 %vm268_vm1, %v267_v3  ;;  %281 = vset.pattern.permute.xlu1 %v394_v33  ;;  %p339_p2 = scmp.ne.s32.totalorder %s224_s10, %s338_s11  ;;  %p344_p4 = scmp.lt.s32.totalorder %s338_s11, %s338_s11 }
  0x2d   :  { %150 = vmax.xlane.f32.xlu0 %v149_v6  ;;  %p345_p5 = por %p344_p4, %p343_p3 }
  0x2f   :  { %p346_p6 = pnand %p345_p5, %p339_p2 }
  0x32   :  { %265 = vmatmul.mubr.msk.f32.vlgmr.msra.gmra.mrb[0].mxu0 %vm47_vm0, %v46_v4 }
  0xb6   :  { %v148_v36 = vpop.xlane.xlu0 %147 }
  0xb7   :  { %v254_v37 = vmul.f32 -1.442695, %v148_v36 }
  0xba   :  { %v151_v38 = vpop.xlane.xlu0 %150 }
  0xbb   :  { %v255_v39 = vmul.f32 -1.442695, %v151_v38 }
 0x105   :  { %v266_v7 = vpop.f32.mrb[0].mxu0 }
 0x106   :  { %v137_v8 = vsel %vm135_vm2, %v266_v7, -inf  ;;  %v126_v9 = vpop.f32.mrb[1].mxu0 }
 0x107   :  { %v138_v10 = vrot.slane %v137_v8, 4  ;;  %136 = vst.msk [vmem:[#allocation7] sm:$0xff] %vm135_vm2, %v126_v9  ;;  %v164_v11 = vsel %vm135_vm2, %v126_v9, -inf }
 0x108   :  { %v165_v12 = vrot.slane %v164_v11, 4 }
 0x109   :  { %v139_v13 = vmax.f32 %v137_v8, %v138_v10 }
 0x10a   :  { %v166_v14 = vmax.f32 %v164_v11, %v165_v12 }
 0x10b   :  { %v140_v15 = vrot.slane %v139_v13, 2 }
 0x10c   :  { %v167_v16 = vrot.slane %v166_v14, 2 }
 0x10d   :  { %v141_v17 = vmax.f32 %v139_v13, %v140_v15 }
 0x10e   :  { %v168_v18 = vmax.f32 %v166_v14, %v167_v16 }
 0x10f   :  { %v142_v19 = vrot.slane %v141_v17, 1 }
 0x110   :  { %v169_v20 = vrot.slane %v168_v18, 1 }
 0x111   :  { %v143_v21 = vmax.f32 %v141_v17, %v142_v19 }
 0x112   :  { %v170_v22 = vmax.f32 %v168_v18, %v169_v20 }
 0x113   :  { %145 = vst.msk [vmem:[#allocation7 + $0x8] sm:$0x1] %vm144_vm3, %v143_v21 }
 0x114   :  { %v171_v23 = vsub.f32 %v126_v9, %v170_v22 }
 0x116   :  { %v172_v24 = vmul.f32 1.442695, %v171_v23 }
 0x118   :  { %282 = vpow2.f32 %v172_v24 }
 0x122   :  { %v283_v25 = vpop.eup %282 }
 0x123   :  { %v174_v26 = vsel %vm135_vm2, %v283_v25, 0.0 }
 0x124   :  { %v175_v27 = vrot.slane %v174_v26, 4 }
 0x126   :  { %v176_v28 = vadd.f32 %v175_v27, %v174_v26 }
 0x128   :  { %v177_v29 = vrot.slane %v176_v28, 2 }
 0x12a   :  { %v178_v30 = vadd.f32 %v177_v29, %v176_v28 }
 0x12c   :  { %v179_v31 = vrot.slane %v178_v30, 1 }
 0x12e   :  { %v180_v32 = vadd.f32 %v179_v31, %v178_v30 }
 0x130   :  { %284 = vrcp.f32 %v180_v32 }
 0x131   :  { %286 = vpow2.f32 %v254_v37 }
 0x132   :  { %288 = vpow2.f32 %v255_v39 }
 0x13a   :  { %v285_v34 = vpop.eup %284 }
 0x13b   :  { %v182_v35 = vsub.f32 1.0, %v285_v34  ;;  %v287_v40 = vpop.eup %286 }
 0x13c   :  { %v158_v41 = vadd.f32 1.0, %v287_v40  ;;  %v289_v42 = vpop.eup %288 }
 0x13d   :  { %185 = vbcast.lane.b32.xlu1 %v182_v35, 256  ;;  %v159_v43 = vadd.f32 1.0, %v289_v42 }
 0x13e   :  { %290 = vrcp.f32 %v158_v41 }
 0x13f   :  { %292 = vrcp.f32 %v159_v43 }
 0x141   :  { %189 = vbcast.lane.b32.xlu1 %v182_v35, 264 }
 0x148   :  { %v291_v44 = vpop.eup %290 }
 0x149   :  { %v293_v47 = vpop.eup %292 }
 0x1af   :  { %v186_v45 = vpop.permute.xlu1 %185 }
 0x1b0   :  { %v193_v46 = vmul.f32 %v291_v44, %v186_v45 }
 0x1b2   :  { %198 = vperm.xlu0 %280, %v193_v46  }
 0x1b3   :  { %v190_v48 = vpop.permute.xlu1 %189 }
 0x1b4   :  { %v194_v49 = vmul.f32 %v293_v47, %v190_v48 }
 0x1b6   :  { %201 = vperm.xlu1 %281, %v194_v49  }
 0x1b7   :  { %349 = shalt.err (!%p346_p6)
}
 0x1b8   :  { %s350_s14 = scalar_lea.hbm %s482_s2, 256 }
 0x1b9   :  { %p351_p7 = scmp.ne.s32.totalorder %s482_s2, %s350_s14  ;;  %p354_p8 = scmp.lt.u32.totalorder %s350_s14, %s482_s2 }
 0x1bb   :  { %p356_p9 = pnand %p354_p8, %p351_p7 }
 0x1bd   :  { %359 = shalt.err (!%p356_p9)
}
 0x1be   :  { %229 = dma.vmem_to_hbm [thread:$0]  %s224_s10, 256, %s482_s2, [#allocation4], %s391_s22, %s391_s22, %s392_s23   ;;  %v203_v50 = vlaneseq  ;;  %vm214_vm4 = vcmask 130112  }
 0x1bf   :  { %s396_s21 = smov [#allocation8]  }
 0x1c0   :  { %v204_v51 = vand.u32 127, %v203_v50  ;;  %v206_v52 = vshrl.u32 %v203_v50, 7  ;;  %s236_s24 = sshll.u32 %s396_s21, 4  ;;  %s237_s24 = int_to_ptr.vmem [resolvable:$true] %s236_s24 }
 0x1c1   :  { %s360_s25 = scalar_lea.vmem %s237_s24, 16  ;;  %s364_s2 = scalar_lea.vmem %s237_s24, 32 }
 0x1c2   :  { %v209_v53 = vadd.s32 4294967288, %v204_v51  ;;  %v207_v54 = vsub.s32 %v204_v51, %v206_v52  ;;  %p361_p10 = scmp.ne.s32.totalorder %s237_s24, %s360_s25  ;;  %p365_p11 = scmp.lt.s32.totalorder %s237_s24, %s237_s24 }
 0x1c3   :  { %p366_p12 = scmp.lt.s32.totalorder %s364_s2, %s360_s25 }
 0x1c4   :  { %v212_v55 = vsub.s32 %v209_v53, %v206_v52 }
 0x1c5   :  { %p367_p13 = por %p366_p12, %p365_p11 }
 0x1c7   :  { %p368_p0 = pnand %p367_p13, %p361_p10 }
 0x231   :  { %v199_v56 = vpop.permute.xlu0 %198 }
 0x232   :  { %v208_v58 = vrot.slane %v199_v56, %v207_v54 }
 0x235   :  { %v202_v57 = vpop.permute.xlu1 %201 }
 0x236   :  { %v213_v59 = vrot.slane %v202_v57, %v212_v55 }
 0x238   :  { %v215_v60 = vsel %vm214_vm4, %v213_v59, %v208_v58 }
 0x239   :  { %217 = vst.msk [vmem:[#allocation8] sm:$0x1] %vm144_vm3, %v215_v60 }
 0x23a   :  { %371 = shalt.err (!%p368_p0)
}
 0x23b   :  { %s372_s26 = scalar_lea.hbm %s483_s3, 16 }
 0x23c   :  { %p373_p1 = scmp.ne.s32.totalorder %s483_s3, %s372_s26  ;;  %p376_p2 = scmp.lt.u32.totalorder %s372_s26, %s483_s3 }
 0x23e   :  { %p378_p3 = pnand %p376_p2, %p373_p1 }
 0x240   :  { %381 = shalt.err (!%p378_p3)
}
 0x241   :  { %239 = dma.vmem_to_hbm [thread:$0]  %s237_s24, 16, %s483_s3, [#allocation9]  }
 0x242   :  { %386 = dma.done.wait [#allocation4], 256  }
 0x243   :  { %387 = vsyncadd [#allocation4], 4294967040 }
 0x244   :  { %388 = dma.done.wait [#allocation9], 16  }
 0x245   :  { %389 = vsyncadd [#allocation9], 4294967280 }
 0x246   :  { %246 = vsyncpa [#allocation3], 1 }
 0x247   :  { %247 = vsyncpa [#allocation6], 1 }
 0x248   :  { %248 = vsyncpa [#allocation4], 1 }
 0x249   :  { %249 = vsyncpa [#allocation9], 1 }

</bundles_post_ra>
